<compile_context>
chip_gen: v5e
topology: v5e:2x2
jax: 0.10.0
libtpu: 0.0.40
codegen_flags: <defaults>
</compile_context>

<pallas_src>
import functools

import jax
import jax.numpy as jnp
from jax.experimental import pallas as pl
from jax.experimental.pallas import tpu as pltpu


def _round_up(x, m):
    return (x + m - 1) // m * m


# ----------------------------------------------------------------------------
# Fused (patches @ weight) + bias -> activation   Pallas kernel
# ----------------------------------------------------------------------------
def _fused_matmul_kernel(x_ref, w_ref, b_ref, o_ref, *, act):
    acc = jnp.dot(x_ref[...], w_ref[...], preferred_element_type=jnp.float32)
    y = acc + b_ref[...]
    if act == "leaky_relu":
        y = jnp.where(y >= 0.0, y, 0.2 * y)
    elif act == "relu":
        y = jnp.maximum(y, 0.0)
    # act == "none": passthrough
    o_ref[...] = y.astype(o_ref.dtype)


def fused_matmul_bias_act(patches, wm, bias, act, out_dtype):
    """[M,K] bf16 patches @ [Kp,Np] bf16 weights (f32 acc) + bias -> activation."""
    M, K = patches.shape
    Kp, Np = wm.shape
    if Kp != K:  # tiny pad (K -> mult of 16) for bf16 sublane packing, not 128
        patches = jnp.pad(patches, ((0, 0), (0, Kp - K)))
    TM = min(256, _round_up(M, 128))
    Mp = _round_up(M, TM)
    if Mp != M:
        patches = jnp.pad(patches, ((0, Mp - M), (0, 0)))

    out = pl.pallas_call(
        functools.partial(_fused_matmul_kernel, act=act),
        out_shape=jax.ShapeDtypeStruct((Mp, Np), out_dtype),
        grid_spec=pltpu.PrefetchScalarGridSpec(
            num_scalar_prefetch=0,
            grid=(Mp // TM,),
            in_specs=[
                pl.BlockSpec((TM, Kp), lambda i: (i, 0)),
                pl.BlockSpec((Kp, Np), lambda i: (0, 0)),   # weight resident
                pl.BlockSpec((1, Np), lambda i: (0, 0)),    # bias resident
            ],
            out_specs=pl.BlockSpec((TM, Np), lambda i: (i, 0)),
        ),
        compiler_params=pltpu.CompilerParams(
            dimension_semantics=("parallel",)),
    )(patches, wm, bias)
    return out[:M]


# ----------------------------------------------------------------------------
# im2col glue + conv / transposed-conv blocks
# ----------------------------------------------------------------------------
def _extract_patches(x, kh, kw, stride, pad):
    """x: [N,H,W,C] -> patches [N,Ho,Wo,kh*kw*C] (kh-major, kw, then C)."""
    xp = jnp.pad(x, ((0, 0), (pad, pad), (pad, pad), (0, 0)))
    _, Hp, Wp, _ = xp.shape
    Ho = (Hp - kh) // stride + 1
    Wo = (Wp - kw) // stride + 1
    cols = []
    for i in range(kh):
        for j in range(kw):
            cols.append(xp[:, i:i + (Ho - 1) * stride + 1:stride,
                           j:j + (Wo - 1) * stride + 1:stride, :])
    return jnp.concatenate(cols, axis=-1), Ho, Wo


def conv_block(x, p, stride=1, pad=1, act="relu", out_dtype=jnp.bfloat16):
    """Conv2d(kxk, stride, pad, bias=False) + folded BN + activation."""
    assert x.shape[-1] == p["cin"]
    patches, Ho, Wo = _extract_patches(x, p["kh"], p["kw"], stride, pad)
    nb = x.shape[0]
    M = nb * Ho * Wo
    pm = patches.reshape(M, p["K"]).astype(jnp.bfloat16)
    out = fused_matmul_bias_act(pm, p["wm"], p["b"], act, out_dtype)
    return out[:, :p["cout"]].reshape(nb, Ho, Wo, p["cout"])


def deconv_block(x, p, act="relu", out_dtype=jnp.bfloat16):
    """ConvTranspose2d(k=4, s=2, p=1, bias=False) + folded BN + activation.

    Realised via 4-phase sub-pixel decomposition: one stride-1 2x2 conv over the
    1-padded input with a phase-stacked weight (N = 4*Cout), then interleave the
    four output parity phases.  No zero-dilated input -> ~4x fewer MACs/bytes.
    """
    nb, h, w, cin = x.shape
    assert cin == p["cin"]
    cout = p["cout"]
    patches, Ho, Wo = _extract_patches(x, 2, 2, 1, 1)       # (h+1, w+1) positions
    M = nb * Ho * Wo
    pm = patches.reshape(M, p["K"]).astype(jnp.bfloat16)
    out = fused_matmul_bias_act(pm, p["wm"], p["b"], act, out_dtype)
    out = out[:, :4 * cout].reshape(nb, Ho, Wo, 4, cout)
    yee = out[:, :h, :w, 0]        # output (even row, even col)
    yeo = out[:, :h, 1:, 1]        # (even, odd)
    yoe = out[:, 1:, :w, 2]        # (odd, even)
    yoo = out[:, 1:, 1:, 3]        # (odd, odd)
    y = jnp.zeros((nb, 2 * h, 2 * w, cout), out_dtype)
    y = y.at[:, 0::2, 0::2].set(yee)
    y = y.at[:, 0::2, 1::2].set(yeo)
    y = y.at[:, 1::2, 0::2].set(yoe)
    y = y.at[:, 1::2, 1::2].set(yoo)
    return y


def conv2x_apply(x, rem, params):
    """Conv2x: stride-2 (de)conv -> concat skip -> 3x3 conv."""
    if params["deconv"]:
        x = deconv_block(x, params["conv1"], act="relu")
    else:
        x = conv_block(x, params["conv1"], stride=2, pad=1, act="relu")
    assert x.shape == rem.shape
    x = jnp.concatenate([x, rem], axis=-1)
    # TODO(synk): for mdconv=True Conv2x, conv2 is a modulated deformable conv;
    # offsets are zero-initialised so it reduces to this regular 3x3 conv here.
    x = conv_block(x, params["conv2"], stride=1, pad=1, act="relu")
    return x


# ----------------------------------------------------------------------------
# Non-conv glue: disparity warp (grid_sample along width)
# ----------------------------------------------------------------------------
def disp_warp(right, disp):
    """Bilinear warp of right image by disparity along width (border padding).

    right: [B,H,W,3], disp: [B,H,W,1] (positive).  warped(x) = right(x - d).
    """
    # TODO(synk): approximates F.grid_sample's normalized-coordinate corner
    # semantics with direct pixel-space bilinear gathering (border clamp).
    b, h, w, c = right.shape
    xs = jnp.arange(w, dtype=jnp.float32)[None, None, :, None]
    src = jnp.clip(xs - disp, 0.0, w - 1.0)
    x0 = jnp.floor(src)
    x1 = jnp.minimum(x0 + 1.0, w - 1.0)
    w1 = src - x0
    w0 = 1.0 - w1
    idx0 = jnp.broadcast_to(x0.astype(jnp.int32), (b, h, w, c))
    idx1 = jnp.broadcast_to(x1.astype(jnp.int32), (b, h, w, c))
    g0 = jnp.take_along_axis(right, idx0, axis=2)
    g1 = jnp.take_along_axis(right, idx1, axis=2)
    return w0 * g0 + w1 * g1


# ----------------------------------------------------------------------------
# Deterministic parameter construction (matmul-ready, BN folded, bf16 weights)
# ----------------------------------------------------------------------------
def _prep_conv(w, scale, bias):
    kh, kw, cin, cout = w.shape
    wf = (w * scale).reshape(kh * kw * cin, cout)           # fold BN scale
    K = kh * kw * cin
    Kp = _round_up(K, 16)
    Np = _round_up(cout, 128)
    wm = jnp.zeros((Kp, Np), jnp.bfloat16).at[:K, :cout].set(wf.astype(jnp.bfloat16))
    b = jnp.zeros((1, Np), jnp.float32).at[0, :cout].set(bias)
    return {"wm": wm, "b": b, "kh": kh, "kw": kw,
            "cin": cin, "cout": cout, "K": K}


def _prep_deconv(w, scale, bias):
    # TODO(synk): weight is treated as the equivalent-conv HWIO layout; loading real
    # PyTorch ConvTranspose2d weights would additionally need a spatial flip + IO swap.
    kh, kw, cin, cout = w.shape      # 4,4
    wf = w * scale
    phases = [wf[0::2, 0::2], wf[0::2, 1::2], wf[1::2, 0::2], wf[1::2, 1::2]]
    wp = jnp.concatenate(phases, axis=-1).reshape(4 * cin, 4 * cout)
    K = 4 * cin
    N = 4 * cout
    Kp = _round_up(K, 16)
    Np = _round_up(N, 128)
    wm = jnp.zeros((Kp, Np), jnp.bfloat16).at[:K, :N].set(wp.astype(jnp.bfloat16))
    b = jnp.zeros((1, Np), jnp.float32).at[0, :N].set(jnp.tile(bias, 4))
    return {"wm": wm, "b": b, "cin": cin, "cout": cout, "K": K}


def _conv_params(key, kh, kw, cin, cout, with_bn=True, with_bias=False, deconv=False):
    k1, k2, k3 = jax.random.split(key, 3)
    std = (2.0 / (kh * kw * cin)) ** 0.5
    w = jax.random.normal(k1, (kh, kw, cin, cout), jnp.float32) * std
    if with_bn:
        # eval-mode BatchNorm: scale = gamma/sqrt(var+eps), bias = beta - mean*scale
        gamma = 1.0 + 0.1 * jax.random.normal(k2, (cout,), jnp.float32)
        beta = 0.1 * jax.random.normal(k3, (cout,), jnp.float32)
        mean = jnp.zeros((cout,), jnp.float32)
        var = jnp.ones((cout,), jnp.float32)
        scale = gamma / jnp.sqrt(var + 1e-5)
        bias = beta - mean * scale
    else:
        scale = jnp.ones((cout,), jnp.float32)
        bias = (0.01 * jax.random.normal(k2, (cout,), jnp.float32)
                if with_bias else jnp.zeros((cout,), jnp.float32))
    if deconv:
        return _prep_deconv(w, scale, bias)
    return _prep_conv(w, scale, bias)


def _conv2x_params(key, cin, cout, deconv):
    k1, k2 = jax.random.split(key)
    if deconv:
        conv1 = _conv_params(k1, 4, 4, cin, cout, deconv=True)
    else:
        conv1 = _conv_params(k1, 3, 3, cin, cout)
    conv2 = _conv_params(k2, 3, 3, 2 * cout, cout)
    return {"conv1": conv1, "conv2": conv2, "deconv": deconv}


def init_params(key):
    keys = iter(jax.random.split(key, 32))
    p = {}
    p["conv1"] = _conv_params(next(keys), 3, 3, 6, 16)
    p["conv2"] = _conv_params(next(keys), 3, 3, 1, 16)
    # TODO(synk): DeformConv2d layers use zero-initialised offsets, so they
    # reduce exactly to regular 3x3 convs here (data-dependent gather omitted).
    p["conv_start"] = _conv_params(next(keys), 3, 3, 32, 32)
    p["conv1a"] = _conv_params(next(keys), 3, 3, 32, 48)
    p["conv2a"] = _conv_params(next(keys), 3, 3, 48, 64)
    p["conv3a"] = _conv_params(next(keys), 3, 3, 64, 96)
    p["conv4a"] = _conv_params(next(keys), 3, 3, 96, 128)
    p["deconv4a"] = _conv2x_params(next(keys), 128, 96, True)
    p["deconv3a"] = _conv2x_params(next(keys), 96, 64, True)
    p["deconv2a"] = _conv2x_params(next(keys), 64, 48, True)
    p["deconv1a"] = _conv2x_params(next(keys), 48, 32, True)
    p["conv1b"] = _conv2x_params(next(keys), 32, 48, False)
    p["conv2b"] = _conv2x_params(next(keys), 48, 64, False)
    p["conv3b"] = _conv2x_params(next(keys), 64, 96, False)   # mdconv
    p["conv4b"] = _conv2x_params(next(keys), 96, 128, False)  # mdconv
    p["deconv4b"] = _conv2x_params(next(keys), 128, 96, True)
    p["deconv3b"] = _conv2x_params(next(keys), 96, 64, True)
    p["deconv2b"] = _conv2x_params(next(keys), 64, 48, True)
    p["deconv1b"] = _conv2x_params(next(keys), 48, 32, True)
    p["final_conv"] = _conv_params(next(keys), 3, 3, 32, 1,
                                   with_bn=False, with_bias=True)
    return p


# ----------------------------------------------------------------------------
# HourglassRefinement forward
# ----------------------------------------------------------------------------
def hourglass_refinement(params, low_disp, left_img, right_img):
    """low_disp: [B,h,w]; left_img/right_img: [B,3,H,W] (PyTorch NCHW API)."""
    assert low_disp.ndim == 3
    left = jnp.transpose(left_img, (0, 2, 3, 1)).astype(jnp.float32)
    right = jnp.transpose(right_img, (0, 2, 3, 1)).astype(jnp.float32)
    B, H, W, _ = left.shape

    disp = low_disp.astype(jnp.float32)[..., None]        # [B,h,w,1]
    scale_factor = W / low_disp.shape[-1]
    if scale_factor != 1.0:
        # matches F.interpolate(mode='bilinear', align_corners=False)
        disp = jax.image.resize(disp, (B, H, W, 1), method="bilinear")
        disp = disp * scale_factor

    warped_right = disp_warp(right, disp)
    error = warped_right - left
    concat1 = jnp.concatenate([error, left], axis=-1)      # [B,H,W,6]

    conv1 = conv_block(concat1, params["conv1"], 1, 1, "leaky_relu")
    conv2 = conv_block(disp, params["conv2"], 1, 1, "leaky_relu")
    x = jnp.concatenate([conv1, conv2], axis=-1)           # 32 channels, bf16
    x = conv_block(x, params["conv_start"], 1, 1, "relu")
    rem0 = x
    x = conv_block(x, params["conv1a"], 2, 1, "relu"); rem1 = x
    x = conv_block(x, params["conv2a"], 2, 1, "relu"); rem2 = x
    x = conv_block(x, params["conv3a"], 2, 1, "relu"); rem3 = x
    x = conv_block(x, params["conv4a"], 2, 1, "relu"); rem4 = x

    x = conv2x_apply(x, rem3, params["deconv4a"]); rem3 = x
    x = conv2x_apply(x, rem2, params["deconv3a"]); rem2 = x
    x = conv2x_apply(x, rem1, params["deconv2a"]); rem1 = x
    x = conv2x_apply(x, rem0, params["deconv1a"]); rem0 = x

    x = conv2x_apply(x, rem1, params["conv1b"]); rem1 = x
    x = conv2x_apply(x, rem2, params["conv2b"]); rem2 = x
    x = conv2x_apply(x, rem3, params["conv3b"]); rem3 = x
    x = conv2x_apply(x, rem4, params["conv4b"])

    x = conv2x_apply(x, rem3, params["deconv4b"])
    x = conv2x_apply(x, rem2, params["deconv3b"])
    x = conv2x_apply(x, rem1, params["deconv2b"])
    x = conv2x_apply(x, rem0, params["deconv1b"])

    residual_disp = conv_block(x, params["final_conv"], 1, 1, "none",
                               out_dtype=jnp.float32)      # bias via fused kernel
    disp = jnp.maximum(disp + residual_disp, 0.0)
    return disp[..., 0]                                     # [B,H,W]


if __name__ == "__main__":
    key = jax.random.PRNGKey(0)
    k1, k2, k3, kp = jax.random.split(key, 4)
    B, H, W = 2, 16, 16                       # H, W divisible by 16
    low_disp = jax.random.uniform(k1, (B, H // 2, W // 2), jnp.float32) * 4.0
    left_img = jax.random.uniform(k2, (B, 3, H, W), jnp.float32)
    right_img = jax.random.uniform(k3, (B, 3, H, W), jnp.float32)

    params = init_params(kp)
    out = hourglass_refinement(params, low_disp, left_img, right_img)
    out = jax.block_until_ready(out)
    assert out.shape == (B, H, W)
    assert bool(jnp.all(jnp.isfinite(out)))
    print("KERNEL_OK")
</pallas_src>

<mosaic_0001>
module attributes {stable_mosaic.version = 11 : i64} {
  func.func @_fused_matmul_kernel(%arg0: i32, %arg1: memref<256x64xbf16, #tpu.memory_space<vmem>>, %arg2: memref<64x128xbf16, #tpu.memory_space<vmem>>, %arg3: memref<1x128xf32, #tpu.memory_space<vmem>>, %arg4: memref<256x128xbf16, #tpu.memory_space<vmem>>) attributes {dimension_semantics = [#tpu.dimension_semantics<parallel>], iteration_bounds = array<i64: 2>, scalar_prefetch = 0 : i64, scratch_operands = 0 : i64, tpu.core_type = #tpu.core_type<tc>, window_params = [{transform_indices = @transform_0, window_bounds = array<i64: 256, 64>}, {pipeline_mode = #tpu.pipeline_mode<synchronous>, transform_indices = @transform_1, window_bounds = array<i64: 64, 128>}, {pipeline_mode = #tpu.pipeline_mode<synchronous>, transform_indices = @transform_2, window_bounds = array<i64: 1, 128>}, {transform_indices = @transform_3, window_bounds = array<i64: 256, 128>}]} {
    %c0 = arith.constant 0 : index
    %c0_0 = arith.constant 0 : index
    %0 = vector.load %arg1[%c0, %c0_0] : memref<256x64xbf16, #tpu.memory_space<vmem>>, vector<256x64xbf16>
    %c0_1 = arith.constant 0 : index
    %c0_2 = arith.constant 0 : index
    %1 = vector.load %arg2[%c0_1, %c0_2] : memref<64x128xbf16, #tpu.memory_space<vmem>>, vector<64x128xbf16>
    %cst = arith.constant dense<0.000000e+00> : vector<256x128xf32>
    %2 = tpu.matmul %0, %1, %cst {dimension_numbers = #tpu.dot_dimension_numbers<[1], [0], [0], [1], [0, 0, 1, 1], [], []>} : vector<256x64xbf16>, vector<64x128xbf16>, vector<256x128xf32> -> vector<256x128xf32>
    %c0_3 = arith.constant 0 : index
    %c0_4 = arith.constant 0 : index
    %3 = vector.load %arg3[%c0_3, %c0_4] : memref<1x128xf32, #tpu.memory_space<vmem>>, vector<1x128xf32>
    %4 = vector.broadcast %3 : vector<1x128xf32> to vector<256x128xf32>
    %5 = arith.addf %2, %4 : vector<256x128xf32>
    %cst_5 = arith.constant 0.000000e+00 : f32
    %6 = vector.broadcast %cst_5 : f32 to vector<256x128xf32>
    %7 = arith.cmpf oge, %5, %6 : vector<256x128xf32>
    %cst_6 = arith.constant 2.000000e-01 : f32
    %8 = vector.broadcast %cst_6 : f32 to vector<256x128xf32>
    %9 = arith.mulf %8, %5 : vector<256x128xf32>
    %10 = arith.select %7, %5, %9 : vector<256x128xi1>, vector<256x128xf32>
    %11 = arith.truncf %10 : vector<256x128xf32> to vector<256x128xbf16>
    %c0_7 = arith.constant 0 : index
    %c0_8 = arith.constant 0 : index
    %12 = vector.load %arg4[%c0_7, %c0_8] : memref<256x128xbf16, #tpu.memory_space<vmem>>, vector<256x128xbf16>
    tpu.vector_store %arg4[%c0_7, %c0_8], %11 {strides = array<i32>} : memref<256x128xbf16, #tpu.memory_space<vmem>>, vector<256x128xbf16>,
    return
  }
  func.func @transform_0(%arg0: i32) -> (i32, i32) {
    %c0_i32 = arith.constant 0 : i32
    %c0_i32_0 = arith.constant 0 : i32
    return %arg0, %c0_i32 : i32, i32
  }
  func.func @transform_1(%arg0: i32) -> (i32, i32) {
    %c0_i32 = arith.constant 0 : i32
    %c0_i32_0 = arith.constant 0 : i32
    %c0_i32_1 = arith.constant 0 : i32
    return %c0_i32, %c0_i32_0 : i32, i32
  }
  func.func @transform_2(%arg0: i32) -> (i32, i32) {
    %c0_i32 = arith.constant 0 : i32
    %c0_i32_0 = arith.constant 0 : i32
    %c0_i32_1 = arith.constant 0 : i32
    return %c0_i32, %c0_i32_0 : i32, i32
  }
  func.func @transform_3(%arg0: i32) -> (i32, i32) {
    %c0_i32 = arith.constant 0 : i32
    %c0_i32_0 = arith.constant 0 : i32
    return %arg0, %c0_i32 : i32, i32
  }
}

</mosaic_0001>

<bundles_post_ra>
// kernel: tpu_custom_call.1
= control target key start
LH: loop header
LB: loop body
LE: loop exit
PB: predicated region body
PF: predicated region fallthrough
CT: control target
= control target key end

     0   :  { %8 = vsyncpa [#allocation3], 0  ;;  %s1251_s0 = inlined_call_operand.vmem [shape: bf16[512,64], index: 0, kind: input, shape index: {}]   ;;  %s1252_s1 = inlined_call_operand.vmem [shape: bf16[64,128], index: 1, kind: input, shape index: {}]   ;;  %s1253_s2 = inlined_call_operand.vmem [shape: f32[1,128], index: 2, kind: input, shape index: {}]   ;;  %s1254_s3 = inlined_call_operand.hbm [shape: bf16[512,128], index: 3, kind: output, shape index: {}]  }
   0x1   :  { %10 = vsyncpa [#allocation3 + $0x1], 0  ;;  %s1061_s12 = smov 0   ;;  %s1063_s13 = smov 0  }
   0x2   :  { %s1065_s14 = smov 0   ;;  %s1067_s15 = smov 0  }
   0x3 LB: > { %s1082_s16 = sadd.s32 4294967295, %s1037_s15   ;;  %s697_s17 = sadd.s32 4294967294, %s1037_s15   ;;  %s1037_s15 = sphi %s1067_s15, %s1260_s15   ;;  %s1033_s14 = sphi %s1065_s14, %s1259_s14   ;;  %s1029_s13 = sphi %s1063_s13, %s1258_s13   ;;  %s1025_s12 = sphi %s1061_s12, %s1257_s12  }
   0x4   : > { %s1086_s18 = sadd.s32 1, %s1037_s15   ;;  %s91_s19 = sadd.s32 1, %s1033_s14 }
   0x5   : > { %s88_s20 = ssub.s32 %s1037_s15, %s1086_s18  ;;  %p101_p0 = scmp.ne.s32.totalorder %s1033_s14, %s1029_s13 }
   0x6   : > { %p89_p1 = scmp.eq.s32.totalorder %s88_s20, 0  ;;  %p102_p2 = scmp.eq.s32.totalorder %s1082_s16, 1 }
   0x7   : > { %p107_p3 = scmp.ne.s32.totalorder %s1029_s13, %s1025_s12  ;;  %p108_p4 = scmp.eq.s32.totalorder %s697_s17, 1 }
   0x8   : > { %s1097_s21 = scalar_select %p89_p1, %s1033_s14, %s91_s19  }
   0x9   : > { %p1099_p5 = por %p102_p2, %p101_p0  ;;  %p1103_p6 = por %p108_p4, %p107_p3 }
   0xa   : > { %p700_p7 = scmp.ge.s32.totalorder %s1037_s15, 1  ;;  %p141_p8 = scmp.lt.s32.totalorder %s1037_s15, 3 }
   0xc   : > { %p142_p9 = pnand %p700_p7, %p141_p8 }
   0xd   : > { %s702_s26 = sshll.u32 (!%p142_p9), %s1082_s16, 5  ;;  %s162_s17 = sand.u32 (!%p142_p9), 1, %s1029_s13  }
   0xe   : > { %145 = sbr.rel (%p142_p9) target bundleno = 236 (0xec), region = 32  ;;  %p166_p10 = scmp.lt.s32.totalorder (!%p142_p9), %s702_s26, 63 }
   0xf   : > { %s701_s19 = sshll.u32 (!%p142_p9), %s162_s17, 7  ;;  %s825_s24 = sshll.u32 (!%p142_p9), %s1082_s16, 7 }
  0x10   : > { %s1173_s20 = scalar_lea.vmem (!%p142_p9), [#allocation2], %s701_s19  ;;  %s631_s16 = scalar_lea.hbm (!%p142_p9), %s1254_s3, %s825_s24 }
  0x11   : > { %s632_s27 = sshll.u32 (!%p142_p9), %s1173_s20, 4  ;;  %s634_s28 = sshll.u32 (!%p142_p9), %s631_s16, 4  ;;  %s633_s27 = int_to_ptr.vmem [resolvable:$true] %s632_s27  ;;  %s635_s28 = int_to_ptr.hbm [resolvable:$true] %s634_s28 }
  0x12   : > { %s620_s29 = scalar_lea.sflag (!%p142_p9), [#allocation3], %s162_s17  ;;  %s989_s30 = sshra.s32 (!%p142_p9), %s635_s28, 4  ;;  %s990_s30 = int_to_ptr.hbm [resolvable:$true] %s989_s30 }
  0x13   : > { %v824_v0 = vld [vmem:[%s1252_s1 + $0x18] sm:$0xff]  ;;  %v823_v1 = vld [vmem:[%s1252_s1 + $0x10] sm:$0xff]  ;;  %s1262_s26 = smov (!%p166_p10, %s702_s26), 63  ;;  %v822_v2 = vld [vmem:[%s1252_s1 + $0x8] sm:$0xff]  ;;  %vm321_vm0 = vcmask 523264   ;;  %s995_s7 = scalar_lea.hbm %s1254_s3, 256 }
  0x14   : > { %374 = vmatpush.bf16.msra.mxu0 %v824_v0  ;;  %921 = vmatpush.bf16.msra.mxu1 %v824_v0  ;;  %s703_s4 = sshll.u32 %s1262_s26, 2  ;;  %v821_v3 = vld [vmem:[%s1252_s1] sm:$0xff]  ;;  %p996_p0 = scmp.lt.s32.totalorder %s990_s30, %s1254_s3 }
  0x15   : > { %922 = vmatpush.bf16.msra.mxu2 %v824_v0  ;;  %923 = vmatpush.bf16.msra.mxu3 %v824_v0  ;;  %s1125_s9 = scalar_lea.vmem %s1251_s0, %s703_s4  ;;  %v1162_v22 = vld [vmem:[%s1253_s2] ss:$0 sm:$0xff]  ;;  %s991_s4 = scalar_lea.hbm %s990_s30, 128 }
  0x16   : > { %v805_v4 = vld [vmem:[%s1125_s9] sm:$0xff]  ;;  %v806_v8 = vld [vmem:[%s1125_s9 + $0x8] sm:$0xff]  ;;  %v807_v12 = vld [vmem:[%s1125_s9 + $0x10] sm:$0xff]  ;;  %p992_p11 = scmp.ne.s32.totalorder %s990_s30, %s991_s4  ;;  %p997_p1 = scmp.lt.s32.totalorder %s995_s7, %s991_s4 }
  0x17   : > { %v809_v5 = vld [vmem:[%s1125_s9 + $0x20] sm:$0xff]  ;;  %v810_v9 = vld [vmem:[%s1125_s9 + $0x28] sm:$0xff]  ;;  %v811_v13 = vld [vmem:[%s1125_s9 + $0x30] sm:$0xff] }
  0x18   : > { %375 = vmatpush.bf16.msra.mxu0 %v823_v1  ;;  %924 = vmatpush.bf16.msra.mxu1 %v823_v1  ;;  %v813_v6 = vld [vmem:[%s1125_s9 + $0x40] sm:$0xff]  ;;  %v814_v10 = vld [vmem:[%s1125_s9 + $0x48] sm:$0xff]  ;;  %v815_v14 = vld [vmem:[%s1125_s9 + $0x50] sm:$0xff]  ;;  %p993_p12 = pnand %p992_p11, %p1099_p5  ;;  %p998_p2 = por %p997_p1, %p996_p0 }
  0x19   : > { %925 = vmatpush.bf16.msra.mxu2 %v823_v1  ;;  %926 = vmatpush.bf16.msra.mxu3 %v823_v1  ;;  %v817_v7 = vld [vmem:[%s1125_s9 + $0x60] sm:$0xff]  ;;  %v818_v11 = vld [vmem:[%s1125_s9 + $0x68] sm:$0xff]  ;;  %v819_v15 = vld [vmem:[%s1125_s9 + $0x70] sm:$0xff] }
  0x1a   : > { %v808_v16 = vld [vmem:[%s1125_s9 + $0x18] sm:$0xff]  ;;  %p994_p13 = pneg %p993_p12 }
  0x1b   : > { %v812_v17 = vld [vmem:[%s1125_s9 + $0x38] sm:$0xff] }
  0x1c   : > { %376 = vmatpush.bf16.msra.mxu0 %v822_v2  ;;  %927 = vmatpush.bf16.msra.mxu1 %v822_v2  ;;  %v816_v18 = vld [vmem:[%s1125_s9 + $0x58] sm:$0xff]  ;;  %p999_p3 = pnand %p998_p2, %p994_p13 }
  0x1d   : > { %928 = vmatpush.bf16.msra.mxu2 %v822_v2  ;;  %929 = vmatpush.bf16.msra.mxu3 %v822_v2  ;;  %v820_v19 = vld [vmem:[%s1125_s9 + $0x78] sm:$0xff] }
  0x20   : > { %377 = vmatpush.bf16.msra.mxu0 %v821_v3  ;;  %930 = vmatpush.bf16.msra.mxu1 %v821_v3 }
  0x21   : > { %931 = vmatpush.bf16.msra.mxu2 %v821_v3  ;;  %932 = vmatpush.bf16.msra.mxu3 %v821_v3 }
  0x23   : > { %784 = vmatmul.msk.bf16.vlgmr.msra.gmra.mxu0 %vm321_vm0, %v805_v4  ;;  %788 = vmatmul.msk.bf16.vlgmr.msra.gmra.mxu1 %vm321_vm0, %v809_v5 }
  0x24   : > { %792 = vmatmul.msk.bf16.vlgmr.msra.gmra.mxu2 %vm321_vm0, %v813_v6  ;;  %796 = vmatmul.msk.bf16.vlgmr.msra.gmra.mxu3 %vm321_vm0, %v817_v7 }
  0x33   : > { %785 = vmatmul.msk.bf16.gmra.mxu0 %vm321_vm0, %v806_v8  ;;  %789 = vmatmul.msk.bf16.gmra.mxu1 %vm321_vm0, %v810_v9 }
  0x34   : > { %793 = vmatmul.msk.bf16.gmra.mxu2 %vm321_vm0, %v814_v10  ;;  %797 = vmatmul.msk.bf16.gmra.mxu3 %vm321_vm0, %v818_v11 }
  0x43   : > { %786 = vmatmul.msk.bf16.gmra.mxu0 %vm321_vm0, %v807_v12  ;;  %790 = vmatmul.msk.bf16.gmra.mxu1 %vm321_vm0, %v811_v13 }
  0x44   : > { %794 = vmatmul.msk.bf16.gmra.mxu2 %vm321_vm0, %v815_v14  ;;  %798 = vmatmul.msk.bf16.gmra.mxu3 %vm321_vm0, %v819_v15 }
  0x53   : > { %787 = vmatmul.msk.bf16.gmra.mxu0 %vm321_vm0, %v808_v16  ;;  %791 = vmatmul.msk.bf16.gmra.mxu1 %vm321_vm0, %v812_v17 }
  0x54   : > { %795 = vmatmul.msk.bf16.gmra.mxu2 %vm321_vm0, %v816_v18  ;;  %799 = vmatmul.msk.bf16.gmra.mxu3 %vm321_vm0, %v820_v19 }
  0xa0   : > { %v379_v20 = vpop.f32.mrf.mxu0  ;;  %v399_v21 = vpop.f32.mrf.mxu1 }
  0xa1   : > { %v380_v23 = vadd.f32 %v1162_v22, %v379_v20  ;;  %v400_v24 = vadd.f32 %v1162_v22, %v399_v21 }
  0xa3   : > { %v491_v29 = vmul.f32 0.2, %v380_v23  ;;  %v499_v30 = vmul.f32 0.2, %v400_v24  ;;  %vm459_vm1 = vcmp.ge.f32.partialorder %v380_v23, 0.0  ;;  %vm467_vm2 = vcmp.ge.f32.partialorder %v400_v24, 0.0 }
  0xa5   : > { %v523_v37 = vsel %vm459_vm1, %v380_v23, %v491_v29  ;;  %v531_v38 = vsel %vm467_vm2, %v400_v24, %v499_v30 }
  0xa7   : > { %v419_v25 = vpop.f32.mrf.mxu2  ;;  %v439_v26 = vpop.f32.mrf.mxu3 }
  0xa8   : > { %v381_v27 = vpop.f32.mrf.mxu0  ;;  %v401_v28 = vpop.f32.mrf.mxu1  ;;  %v420_v35 = vadd.f32 %v1162_v22, %v419_v25  ;;  %v440_v36 = vadd.f32 %v1162_v22, %v439_v26 }
  0xa9   : > { %v382_v31 = vadd.f32 %v1162_v22, %v381_v27  ;;  %v402_v32 = vadd.f32 %v1162_v22, %v401_v28 }
  0xaa   : > { %v507_v45 = vmul.f32 0.2, %v420_v35  ;;  %v515_v46 = vmul.f32 0.2, %v440_v36  ;;  %vm475_vm5 = vcmp.ge.f32.partialorder %v420_v35, 0.0  ;;  %vm483_vm6 = vcmp.ge.f32.partialorder %v440_v36, 0.0 }
  0xab   : > { %vm460_vm3 = vcmp.ge.f32.partialorder %v382_v31, 0.0  ;;  %v492_v33 = vmul.f32 0.2, %v382_v31  ;;  %vm468_vm4 = vcmp.ge.f32.partialorder %v402_v32, 0.0  ;;  %v500_v34 = vmul.f32 0.2, %v402_v32 }
  0xac   : > { %v539_v53 = vsel %vm475_vm5, %v420_v35, %v507_v45  ;;  %v547_v54 = vsel %vm483_vm6, %v440_v36, %v515_v46 }
  0xad   : > { %v524_v39 = vsel %vm460_vm3, %v382_v31, %v492_v33  ;;  %v532_v40 = vsel %vm468_vm4, %v402_v32, %v500_v34 }
  0xae   : > { %v829_v41 = vpack.c.bf16 %v524_v39, %v523_v37  ;;  %v849_v42 = vpack.c.bf16 %v532_v40, %v531_v38 }
  0xaf   : > { %v421_v43 = vpop.f32.mrf.mxu2  ;;  %v441_v44 = vpop.f32.mrf.mxu3 }
  0xb0   : > { %830 = vst [vmem:[%s1173_s20] sm:$0xff] %v829_v41   ;;  %v422_v47 = vadd.f32 %v1162_v22, %v421_v43  ;;  %v442_v48 = vadd.f32 %v1162_v22, %v441_v44  ;;  %v384_v49 = vpop.f32.mrf.mxu0  ;;  %v404_v50 = vpop.f32.mrf.mxu1 }
  0xb1   : > { %909 = vst [vmem:[%s1173_s20 + $0x20] sm:$0xff] %v849_v42   ;;  %v385_v59 = vadd.f32 %v1162_v22, %v384_v49  ;;  %v405_v60 = vadd.f32 %v1162_v22, %v404_v50 }
  0xb2   : > { %vm476_vm7 = vcmp.ge.f32.partialorder %v422_v47, 0.0  ;;  %v508_v51 = vmul.f32 0.2, %v422_v47  ;;  %vm484_vm8 = vcmp.ge.f32.partialorder %v442_v48, 0.0  ;;  %v516_v52 = vmul.f32 0.2, %v442_v48 }
  0xb3   : > { %v493_v1 = vmul.f32 0.2, %v385_v59  ;;  %v501_v2 = vmul.f32 0.2, %v405_v60  ;;  %vm461_vm9 = vcmp.ge.f32.partialorder %v385_v59, 0.0  ;;  %vm469_vm10 = vcmp.ge.f32.partialorder %v405_v60, 0.0 }
  0xb4   : > { %v540_v55 = vsel %vm476_vm7, %v422_v47, %v508_v51  ;;  %v548_v56 = vsel %vm484_vm8, %v442_v48, %v516_v52 }
  0xb5   : > { %v869_v57 = vpack.c.bf16 %v540_v55, %v539_v53  ;;  %v889_v58 = vpack.c.bf16 %v548_v56, %v547_v54  ;;  %v525_v9 = vsel %vm461_vm9, %v385_v59, %v493_v1  ;;  %v533_v10 = vsel %vm469_vm10, %v405_v60, %v501_v2 }
  0xb7   : > { %913 = vst [vmem:[%s1173_s20 + $0x40] sm:$0xff] %v869_v57   ;;  %v424_v61 = vpop.f32.mrf.mxu2  ;;  %v444_v62 = vpop.f32.mrf.mxu3 }
  0xb8   : > { %917 = vst [vmem:[%s1173_s20 + $0x60] sm:$0xff] %v889_v58   ;;  %v386_v63 = vpop.f32.mrf.mxu0  ;;  %v406_v0 = vpop.f32.mrf.mxu1  ;;  %v425_v7 = vadd.f32 %v1162_v22, %v424_v61  ;;  %v445_v8 = vadd.f32 %v1162_v22, %v444_v62 }
  0xb9   : > { %v387_v3 = vadd.f32 %v1162_v22, %v386_v63  ;;  %v407_v4 = vadd.f32 %v1162_v22, %v406_v0 }
  0xba   : > { %v509_v17 = vmul.f32 0.2, %v425_v7  ;;  %v517_v18 = vmul.f32 0.2, %v445_v8  ;;  %vm477_vm13 = vcmp.ge.f32.partialorder %v425_v7, 0.0  ;;  %vm485_vm14 = vcmp.ge.f32.partialorder %v445_v8, 0.0 }
  0xbb   : > { %vm462_vm11 = vcmp.ge.f32.partialorder %v387_v3, 0.0  ;;  %v494_v5 = vmul.f32 0.2, %v387_v3  ;;  %vm470_vm12 = vcmp.ge.f32.partialorder %v407_v4, 0.0  ;;  %v502_v6 = vmul.f32 0.2, %v407_v4 }
  0xbc   : > { %v541_v26 = vsel %vm477_vm13, %v425_v7, %v509_v17  ;;  %v549_v27 = vsel %vm485_vm14, %v445_v8, %v517_v18 }
  0xbd   : > { %v526_v11 = vsel %vm462_vm11, %v387_v3, %v494_v5  ;;  %v534_v12 = vsel %vm470_vm12, %v407_v4, %v502_v6 }
  0xbe   : > { %v834_v13 = vpack.c.bf16 %v526_v11, %v525_v9  ;;  %v854_v14 = vpack.c.bf16 %v534_v12, %v533_v10 }
  0xbf   : > { %v426_v15 = vpop.f32.mrf.mxu2  ;;  %v446_v16 = vpop.f32.mrf.mxu3 }
  0xc0   : > { %906 = vst [vmem:[%s1173_s20 + $0x8] sm:$0xff] %v834_v13   ;;  %v427_v19 = vadd.f32 %v1162_v22, %v426_v15  ;;  %v447_v20 = vadd.f32 %v1162_v22, %v446_v16  ;;  %v389_v21 = vpop.f32.mrf.mxu0  ;;  %v409_v23 = vpop.f32.mrf.mxu1 }
  0xc1   : > { %910 = vst [vmem:[%s1173_s20 + $0x28] sm:$0xff] %v854_v14   ;;  %v390_v32 = vadd.f32 %v1162_v22, %v389_v21  ;;  %v410_v33 = vadd.f32 %v1162_v22, %v409_v23 }
  0xc2   : > { %vm478_vm15 = vcmp.ge.f32.partialorder %v427_v19, 0.0  ;;  %v510_v24 = vmul.f32 0.2, %v427_v19  ;;  %vm486_vm0 = vcmp.ge.f32.partialorder %v447_v20, 0.0  ;;  %v518_v25 = vmul.f32 0.2, %v447_v20 }
  0xc3   : > { %v495_v38 = vmul.f32 0.2, %v390_v32  ;;  %v503_v39 = vmul.f32 0.2, %v410_v33  ;;  %vm463_vm1 = vcmp.ge.f32.partialorder %v390_v32, 0.0  ;;  %vm471_vm2 = vcmp.ge.f32.partialorder %v410_v33, 0.0 }
  0xc4   : > { %v542_v28 = vsel %vm478_vm15, %v427_v19, %v510_v24  ;;  %v550_v29 = vsel %vm486_vm0, %v447_v20, %v518_v25 }
  0xc5   : > { %v874_v30 = vpack.c.bf16 %v542_v28, %v541_v26  ;;  %v894_v31 = vpack.c.bf16 %v550_v29, %v549_v27  ;;  %v527_v46 = vsel %vm463_vm1, %v390_v32, %v495_v38  ;;  %v535_v47 = vsel %vm471_vm2, %v410_v33, %v503_v39 }
  0xc7   : > { %914 = vst [vmem:[%s1173_s20 + $0x48] sm:$0xff] %v874_v30   ;;  %v429_v34 = vpop.f32.mrf.mxu2  ;;  %v449_v35 = vpop.f32.mrf.mxu3 }
  0xc8   : > { %918 = vst [vmem:[%s1173_s20 + $0x68] sm:$0xff] %v894_v31   ;;  %v391_v36 = vpop.f32.mrf.mxu0  ;;  %v411_v37 = vpop.f32.mrf.mxu1  ;;  %v430_v44 = vadd.f32 %v1162_v22, %v429_v34  ;;  %v450_v45 = vadd.f32 %v1162_v22, %v449_v35 }
  0xc9   : > { %v392_v40 = vadd.f32 %v1162_v22, %v391_v36  ;;  %v412_v41 = vadd.f32 %v1162_v22, %v411_v37 }
  0xca   : > { %v511_v54 = vmul.f32 0.2, %v430_v44  ;;  %v519_v55 = vmul.f32 0.2, %v450_v45  ;;  %vm479_vm5 = vcmp.ge.f32.partialorder %v430_v44, 0.0  ;;  %vm487_vm6 = vcmp.ge.f32.partialorder %v450_v45, 0.0 }
  0xcb   : > { %vm464_vm3 = vcmp.ge.f32.partialorder %v392_v40, 0.0  ;;  %v496_v42 = vmul.f32 0.2, %v392_v40  ;;  %vm472_vm4 = vcmp.ge.f32.partialorder %v412_v41, 0.0  ;;  %v504_v43 = vmul.f32 0.2, %v412_v41 }
  0xcc   : > { %v543_v62 = vsel %vm479_vm5, %v430_v44, %v511_v54  ;;  %v551_v63 = vsel %vm487_vm6, %v450_v45, %v519_v55 }
  0xcd   : > { %v528_v48 = vsel %vm464_vm3, %v392_v40, %v496_v42  ;;  %v536_v49 = vsel %vm472_vm4, %v412_v41, %v504_v43 }
  0xce   : > { %v839_v50 = vpack.c.bf16 %v528_v48, %v527_v46  ;;  %v859_v51 = vpack.c.bf16 %v536_v49, %v535_v47 }
  0xcf   : > { %v431_v52 = vpop.f32.mrf.mxu2  ;;  %v451_v53 = vpop.f32.mrf.mxu3 }
  0xd0   : > { %907 = vst [vmem:[%s1173_s20 + $0x10] sm:$0xff] %v839_v50   ;;  %v432_v56 = vadd.f32 %v1162_v22, %v431_v52  ;;  %v452_v57 = vadd.f32 %v1162_v22, %v451_v53  ;;  %v394_v58 = vpop.f32.mrf.mxu0  ;;  %v414_v59 = vpop.f32.mrf.mxu1 }
  0xd1   : > { %911 = vst [vmem:[%s1173_s20 + $0x30] sm:$0xff] %v859_v51   ;;  %v395_v4 = vadd.f32 %v1162_v22, %v394_v58  ;;  %v415_v5 = vadd.f32 %v1162_v22, %v414_v59 }
  0xd2   : > { %vm480_vm7 = vcmp.ge.f32.partialorder %v432_v56, 0.0  ;;  %v512_v60 = vmul.f32 0.2, %v432_v56  ;;  %vm488_vm8 = vcmp.ge.f32.partialorder %v452_v57, 0.0  ;;  %v520_v61 = vmul.f32 0.2, %v452_v57 }
  0xd3   : > { %v497_v10 = vmul.f32 0.2, %v395_v4  ;;  %v505_v11 = vmul.f32 0.2, %v415_v5  ;;  %vm465_vm9 = vcmp.ge.f32.partialorder %v395_v4, 0.0  ;;  %vm473_vm10 = vcmp.ge.f32.partialorder %v415_v5, 0.0 }
  0xd4   : > { %v544_v0 = vsel %vm480_vm7, %v432_v56, %v512_v60  ;;  %v552_v1 = vsel %vm488_vm8, %v452_v57, %v520_v61 }
  0xd5   : > { %v879_v2 = vpack.c.bf16 %v544_v0, %v543_v62  ;;  %v899_v3 = vpack.c.bf16 %v552_v1, %v551_v63  ;;  %v529_v18 = vsel %vm465_vm9, %v395_v4, %v497_v10  ;;  %v537_v19 = vsel %vm473_vm10, %v415_v5, %v505_v11 }
  0xd7   : > { %915 = vst [vmem:[%s1173_s20 + $0x50] sm:$0xff] %v879_v2   ;;  %v434_v6 = vpop.f32.mrf.mxu2  ;;  %v454_v7 = vpop.f32.mrf.mxu3 }
  0xd8   : > { %919 = vst [vmem:[%s1173_s20 + $0x70] sm:$0xff] %v899_v3   ;;  %v396_v8 = vpop.f32.mrf.mxu0  ;;  %v416_v9 = vpop.f32.mrf.mxu1  ;;  %v435_v16 = vadd.f32 %v1162_v22, %v434_v6  ;;  %v455_v17 = vadd.f32 %v1162_v22, %v454_v7 }
  0xd9   : > { %v397_v12 = vadd.f32 %v1162_v22, %v396_v8  ;;  %v417_v13 = vadd.f32 %v1162_v22, %v416_v9 }
  0xda   : > { %v513_v27 = vmul.f32 0.2, %v435_v16  ;;  %v521_v28 = vmul.f32 0.2, %v455_v17  ;;  %vm481_vm13 = vcmp.ge.f32.partialorder %v435_v16, 0.0  ;;  %vm489_vm14 = vcmp.ge.f32.partialorder %v455_v17, 0.0 }
  0xdb   : > { %vm466_vm11 = vcmp.ge.f32.partialorder %v397_v12, 0.0  ;;  %v498_v14 = vmul.f32 0.2, %v397_v12  ;;  %vm474_vm12 = vcmp.ge.f32.partialorder %v417_v13, 0.0  ;;  %v506_v15 = vmul.f32 0.2, %v417_v13 }
  0xdc   : > { %v545_v33 = vsel %vm481_vm13, %v435_v16, %v513_v27  ;;  %v553_v34 = vsel %vm489_vm14, %v455_v17, %v521_v28 }
  0xdd   : > { %v530_v20 = vsel %vm466_vm11, %v397_v12, %v498_v14  ;;  %v538_v21 = vsel %vm474_vm12, %v417_v13, %v506_v15 }
  0xde   : > { %v844_v23 = vpack.c.bf16 %v530_v20, %v529_v18  ;;  %v864_v24 = vpack.c.bf16 %v538_v21, %v537_v19 }
  0xdf   : > { %v436_v25 = vpop.f32.mrf.mxu2  ;;  %v456_v26 = vpop.f32.mrf.mxu3 }
  0xe0   : > { %908 = vst [vmem:[%s1173_s20 + $0x18] sm:$0xff] %v844_v23   ;;  %v437_v29 = vadd.f32 %v1162_v22, %v436_v25  ;;  %v457_v30 = vadd.f32 %v1162_v22, %v456_v26 }
  0xe1   : > { %912 = vst [vmem:[%s1173_s20 + $0x38] sm:$0xff] %v864_v24  }
  0xe2   : > { %vm482_vm15 = vcmp.ge.f32.partialorder %v437_v29, 0.0  ;;  %v514_v31 = vmul.f32 0.2, %v437_v29  ;;  %vm490_vm0 = vcmp.ge.f32.partialorder %v457_v30, 0.0  ;;  %v522_v32 = vmul.f32 0.2, %v457_v30 }
  0xe4   : > { %v546_v35 = vsel %vm482_vm15, %v437_v29, %v514_v31  ;;  %v554_v36 = vsel %vm490_vm0, %v457_v30, %v522_v32 }
  0xe5   : > { %v884_v37 = vpack.c.bf16 %v546_v35, %v545_v33  ;;  %v904_v38 = vpack.c.bf16 %v554_v36, %v553_v34 }
  0xe7   : > { %916 = vst [vmem:[%s1173_s20 + $0x58] sm:$0xff] %v884_v37  }
  0xe8   : > { %920 = vst [vmem:[%s1173_s20 + $0x78] sm:$0xff] %v904_v38  }
  0xe9   : > { %1002 = shalt.err (!%p999_p3)
}
  0xea   : > { %s1039_s10 = smov 64   ;;  %s1040_s11 = smov 4  }
  0xeb   : > { %933 = dma.vmem_to_hbm [thread:$0]  (%p1099_p5), %s633_s27, 2048, %s635_s28, %s620_s29, %s1039_s10, %s1039_s10, %s1040_s11  }
  0xec PF: > { %p939_p4 = scmp.ge.s32.totalorder %s1037_s15, 2  ;;  %s649_s17 = sand.u32 1, %s1025_s12  }
  0xed   : > { %s650_s19 = scalar_lea.sflag [#allocation3], %s649_s17 }
  0xee   : > { %p936_p7 = pnand %p939_p4, %p1103_p6 }
  0xf0   : > { %p937_p8 = pneg %p936_p7 }
  0xf2   : > { %1020 = dma.done.wait (%p937_p8), %s650_s19, 2048  }
  0xf3   : > { %1022 = vsyncadd (%p937_p8), %s650_s19, 4294965248  ;;  %p13_p9 = scmp.ge.s32.totalorder %s1086_s18, 4   ;;  %s1257_s12 = smov %s1029_s13 }
  0xf4   : > { %s1258_s13 = smov %s1033_s14  ;;  %s1259_s14 = smov %s1097_s21 }
  0xf5   : > { %s1260_s15 = smov %s1086_s18  ;;  %15 = sbr.rel (!%p13_p9) target bundleno = 3 (0x3), region = 67 }
  0xfa   :  { %656 = vsyncpa [#allocation3], 1 }
  0xfb   :  { %658 = vsyncpa [#allocation3 + $0x1], 1 }

</bundles_post_ra>
